<compile_context>
chip_gen: v6e
topology: v6e:2x2x1
jax: 0.10.0
libtpu: 0.0.40
codegen_flags: <defaults>
</compile_context>

<pallas_src>
import jax
import jax.numpy as jnp
from jax.experimental import pallas as pl
from jax.experimental.pallas import tpu as pltpu


def _bag_accum_kernel(y_true_ref, y_pred_ref, sums_ref, cnts_ref, acc_ref, cnt_ref):
    """Accumulate per-bag sums (B, C) and counts (B, 1) over one split's tiles."""
    k = pl.program_id(1)

    @pl.when(k == 0)
    def _():
        acc_ref[...] = jnp.zeros_like(acc_ref)
        cnt_ref[...] = jnp.zeros_like(cnt_ref)

    B = acc_ref.shape[0]
    tile_n = y_true_ref.shape[1]

    x = y_pred_ref[...]                                            # (TILE_N, C) input dtype
    bag_ids = y_true_ref[...]                                      # (1, TILE_N) int32
    iota_b = jax.lax.broadcasted_iota(jnp.int32, (B, tile_n), 0)   # (B, TILE_N)
    # Lane-dense one-hot: bag axis on sublanes, sample axis on lanes.
    one_hot = (bag_ids == iota_b).astype(x.dtype)                  # (B, TILE_N)

    # Per-bag sums: contract the sample axis on the MXU, accumulate in f32.
    acc_ref[...] += jax.lax.dot_general(
        one_hot, x,
        dimension_numbers=(((1,), (0,)), ((), ())),
        preferred_element_type=jnp.float32)                        # (B, C)

    # Per-bag counts fused into a second MXU pass (no XLU cross-lane reduce).
    ones_col = jnp.ones((tile_n, 1), dtype=x.dtype)
    cnt_ref[...] += jax.lax.dot_general(
        one_hot, ones_col,
        dimension_numbers=(((1,), (0,)), ((), ())),
        preferred_element_type=jnp.float32)                        # (B, 1)

    @pl.when(k == pl.num_programs(1) - 1)
    def _():
        sums_ref[...] = acc_ref[...]
        cnts_ref[...] = cnt_ref[...]


def _prop_finalize_kernel(sums_ref, cnts_ref, theta_ref, out_ref):
    """Combine per-split partials, softmax over classes, CE vs theta, sum to scalar."""
    bag_sums = jnp.sum(sums_ref[...], axis=0)                      # (B, C) f32
    counts = jnp.sum(cnts_ref[...], axis=0)                        # (B, 1) f32

    # counts == 0 (empty bag) -> NaN, matching torch's mean over an empty slice.
    mean_pred = bag_sums / counts                                  # (B, C)

    # Softmax over classes; all elementwise math in f32 (v5e has no bf16 VPU/EUP).
    m = jnp.max(mean_pred, axis=-1, keepdims=True)
    e = jnp.exp(mean_pred - m)
    # Exact divide: this epilogue runs once on a tiny (B, C) tile, so the
    # EUP-approx pl.reciprocal(..., approx=True) saves nothing measurable and
    # exact keeps the torch epsilon semantics numerically tight.
    p = e / jnp.sum(e, axis=-1, keepdims=True)

    theta_c = jnp.clip(theta_ref[...].astype(jnp.float32), 1e-7, 1.0 - 1e-7)
    loss = -theta_c * jnp.log(p + 1e-7)                            # (B, C)
    out_ref[0, 0] = jnp.sum(loss)


def prop_loss(y_true, y_pred, theta, *, tile_n=1024, num_splits=1):
    """ProportionLoss.

    y_true: (N,) int bag ids in [0, B); y_pred: (N, C) float (pass bf16 to halve
    the dominant HBM stream -- accumulation is f32 either way); theta: (B, C).
    num_splits: set 2 on v7x to shard the N-reduction across both TensorCores
    (the leading grid axis is "parallel"); leave 1 on v5e/v6e.
    """
    N, C = y_pred.shape
    B, _ = theta.shape
    y_true = y_true.astype(jnp.int32).reshape(N)

    # --- choose the sample tiling --------------------------------------------
    if num_splits == 1 and N <= tile_n:
        tile = N                      # single tile: block == full array, no padding
        num_tiles = 1
    else:
        # Multi-tile: tile must be lane-aligned (multiple of 128) for the (1, tile)
        # y_true block and sublane-aligned (multiple of 8) for the (tile, C) block.
        tile = max(128, (min(tile_n, N + 127) // 128) * 128)
        num_tiles = pl.cdiv(N, tile)
        num_tiles = pl.cdiv(num_tiles, num_splits) * num_splits
    k_steps = num_tiles // num_splits
    n_padded = num_tiles * tile

    # Pad the sample axis: bag id == B matches no bag, so padded rows contribute
    # nothing to sums or counts; padded y_pred rows are zero (never NaN garbage).
    if n_padded != N:
        pad = n_padded - N
        y_true = jnp.concatenate([y_true, jnp.full((pad,), B, jnp.int32)])
        y_pred = jnp.concatenate([y_pred, jnp.zeros((pad, C), y_pred.dtype)], axis=0)

    y_true_row = y_true.reshape(1, n_padded)     # bag ids on the lane axis

    partial_sums, partial_cnts = pl.pallas_call(
        _bag_accum_kernel,
        out_shape=(
            jax.ShapeDtypeStruct((num_splits, B, C), jnp.float32),
            jax.ShapeDtypeStruct((num_splits, B, 1), jnp.float32),
        ),
        grid_spec=pltpu.PrefetchScalarGridSpec(
            num_scalar_prefetch=0,
            grid=(num_splits, k_steps),
            in_specs=[
                pl.BlockSpec((1, tile), lambda s, k: (0, s * k_steps + k)),
                pl.BlockSpec((tile, C), lambda s, k: (s * k_steps + k, 0)),
            ],
            out_specs=[
                pl.BlockSpec((None, B, C), lambda s, k: (s, 0, 0)),
                pl.BlockSpec((None, B, 1), lambda s, k: (s, 0, 0)),
            ],
            scratch_shapes=[
                pltpu.VMEM((B, C), jnp.float32),
                pltpu.VMEM((B, 1), jnp.float32),
            ],
        ),
        compiler_params=pltpu.CompilerParams(
            dimension_semantics=("parallel", "arbitrary"),
            vmem_limit_bytes=32 * 1024 * 1024,   # explicit budget, portable to v7x
        ),
    )(y_true_row, y_pred)

    # Tiny epilogue: combine split partials, softmax + CE, emit the scalar loss.
    out = pl.pallas_call(
        _prop_finalize_kernel,
        out_shape=jax.ShapeDtypeStruct((1, 1), jnp.float32),
        grid=(1,),
        in_specs=[
            pl.BlockSpec((num_splits, B, C), lambda i: (0, 0, 0)),
            pl.BlockSpec((num_splits, B, 1), lambda i: (0, 0, 0)),
            pl.BlockSpec((B, C), lambda i: (0, 0)),
        ],
        out_specs=pl.BlockSpec((1, 1), lambda i: (0, 0)),
    )(partial_sums, partial_cnts, theta.astype(jnp.float32))
    return out[0, 0]


def prop_loss_ref(y_true, y_pred, theta):
    """Pure-JAX reference (same matmul formulation -> same default-precision
    treatment of y_pred as the in-kernel MXU path)."""
    B, C = theta.shape
    one_hot = (y_true[:, None] == jnp.arange(B)[None, :]).astype(jnp.float32)  # (N, B)
    bag_sums = one_hot.T @ y_pred.astype(jnp.float32)                          # (B, C)
    counts = jnp.sum(one_hot, axis=0)[:, None]
    mean_pred = bag_sums / counts
    p = jax.nn.softmax(mean_pred, axis=-1)
    theta_c = jnp.clip(theta.astype(jnp.float32), 1e-7, 1.0 - 1e-7)
    return jnp.sum(-theta_c * jnp.log(p + 1e-7))


if __name__ == "__main__":
    key = jax.random.PRNGKey(0)
    k1, k2, k3, k4 = jax.random.split(key, 4)

    Bag_Number = 4     # B
    Class_Number = 8   # C

    # theta: per-bag class proportions (rows sum to 1), deterministic.
    theta_raw = jax.random.uniform(k3, (Bag_Number, Class_Number), dtype=jnp.float32) + 0.1
    theta = theta_raw / jnp.sum(theta_raw, axis=-1, keepdims=True)

    # --- Case 1: small, f32, single tile / single split ----------------------
    N1 = 32
    y_true1 = jax.random.permutation(k1, jnp.arange(N1, dtype=jnp.int32) % Bag_Number)
    y_pred1 = jax.random.normal(k2, (N1, Class_Number), dtype=jnp.float32)

    out1 = jax.block_until_ready(prop_loss(y_true1, y_pred1, theta))
    ref1 = prop_loss_ref(y_true1, y_pred1, theta)
    assert jnp.allclose(out1, ref1, rtol=1e-5, atol=1e-5), (out1, ref1)

    # --- Case 2: bf16 streaming + 2-way split (v7x megacore path) + padding --
    y_pred1_bf16 = y_pred1.astype(jnp.bfloat16)
    out2 = jax.block_until_ready(
        prop_loss(y_true1, y_pred1_bf16, theta, tile_n=128, num_splits=2))
    ref2 = prop_loss_ref(y_true1, y_pred1_bf16.astype(jnp.float32), theta)
    assert jnp.allclose(out2, ref2, rtol=1e-4, atol=1e-4), (out2, ref2)

    # --- Case 3: multi-tile accumulation over k (N not a tile multiple) ------
    N3 = 4000
    y_true3 = jax.random.permutation(k4, jnp.arange(N3, dtype=jnp.int32) % Bag_Number)
    y_pred3 = jax.random.normal(k2, (N3, Class_Number), dtype=jnp.float32)
    out3 = jax.block_until_ready(
        prop_loss(y_true3, y_pred3, theta, tile_n=512, num_splits=2))
    ref3 = prop_loss_ref(y_true3, y_pred3, theta)
    assert jnp.allclose(out3, ref3, rtol=1e-4, atol=1e-4), (out3, ref3)

    print("KERNEL_OK")
</pallas_src>

<mosaic_0001>
module attributes {stable_mosaic.version = 11 : i64} {
  func.func @_bag_accum_kernel(%arg0: i32, %arg1: i32, %arg2: memref<1x32xi32, #tpu.memory_space<vmem>>, %arg3: memref<32x8xf32, #tpu.memory_space<vmem>>, %arg4: memref<1x4x8xf32, #tpu.memory_space<vmem>>, %arg5: memref<1x4x1xf32, #tpu.memory_space<vmem>>, %arg6: memref<4x8xf32, #tpu.memory_space<vmem>>, %arg7: memref<4x1xf32, #tpu.memory_space<vmem>>) attributes {dimension_semantics = [#tpu.dimension_semantics<parallel>, #tpu.dimension_semantics<arbitrary>], iteration_bounds = array<i64: 1, 1>, scalar_prefetch = 0 : i64, scratch_operands = 2 : i64, tpu.core_type = #tpu.core_type<tc>, window_params = [{transform_indices = @transform_0, window_bounds = array<i64: 1, 32>}, {transform_indices = @transform_1, window_bounds = array<i64: 32, 8>}, {transform_indices = @transform_2, window_bounds = array<i64: 1, 4, 8>}, {transform_indices = @transform_3, window_bounds = array<i64: 1, 4, 1>}]} {
    %c0_i32 = arith.constant 0 : i32
    %0 = arith.cmpi eq, %arg1, %c0_i32 : i32
    %1 = arith.extui %0 : i1 to i32
    %c0_i32_0 = arith.constant 0 : i32
    %2 = arith.cmpi ne, %1, %c0_i32_0 : i32
    scf.if %2 {
      %cst_16 = arith.constant 0.000000e+00 : f32
      %22 = vector.broadcast %cst_16 : f32 to vector<4x8xf32>
      %c0_17 = arith.constant 0 : index
      %c0_18 = arith.constant 0 : index
      %23 = vector.load %arg6[%c0_17, %c0_18] : memref<4x8xf32, #tpu.memory_space<vmem>>, vector<4x8xf32>
      tpu.vector_store %arg6[%c0_17, %c0_18], %22 {strides = array<i32>} : memref<4x8xf32, #tpu.memory_space<vmem>>, vector<4x8xf32>,
      %cst_19 = arith.constant 0.000000e+00 : f32
      %24 = vector.broadcast %cst_19 : f32 to vector<4x1xf32>
      %c0_20 = arith.constant 0 : index
      %c0_21 = arith.constant 0 : index
      %25 = vector.load %arg7[%c0_20, %c0_21] : memref<4x1xf32, #tpu.memory_space<vmem>>, vector<4x1xf32>
      tpu.vector_store %arg7[%c0_20, %c0_21], %24 {strides = array<i32>} : memref<4x1xf32, #tpu.memory_space<vmem>>, vector<4x1xf32>,
    } else {
    }
    %c0 = arith.constant 0 : index
    %c0_1 = arith.constant 0 : index
    %3 = vector.load %arg3[%c0, %c0_1] : memref<32x8xf32, #tpu.memory_space<vmem>>, vector<32x8xf32>
    %c0_2 = arith.constant 0 : index
    %c0_3 = arith.constant 0 : index
    %4 = vector.load %arg2[%c0_2, %c0_3] : memref<1x32xi32, #tpu.memory_space<vmem>>, vector<1x32xi32>
    %5 = tpu.iota {dimensions = array<i32: 0>} : vector<4x32xi32>
    %6 = vector.broadcast %4 : vector<1x32xi32> to vector<4x32xi32>
    %7 = arith.cmpi eq, %6, %5 : vector<4x32xi32>
    %8 = arith.extui %7 : vector<4x32xi1> to vector<4x32xi32>
    %9 = arith.sitofp %8 : vector<4x32xi32> to vector<4x32xf32>
    %c0_4 = arith.constant 0 : index
    %c0_5 = arith.constant 0 : index
    %10 = vector.load %arg6[%c0_4, %c0_5] : memref<4x8xf32, #tpu.memory_space<vmem>>, vector<4x8xf32>
    %cst = arith.constant dense<0.000000e+00> : vector<4x8xf32>
    %11 = tpu.matmul %9, %3, %cst {dimension_numbers = #tpu.dot_dimension_numbers<[1], [0], [0], [1], [0, 0, 1, 1], [], []>} : vector<4x32xf32>, vector<32x8xf32>, vector<4x8xf32> -> vector<4x8xf32>
    %12 = arith.addf %10, %11 : vector<4x8xf32>
    %c0_6 = arith.constant 0 : index
    %c0_7 = arith.constant 0 : index
    %13 = vector.load %arg6[%c0_6, %c0_7] : memref<4x8xf32, #tpu.memory_space<vmem>>, vector<4x8xf32>
    tpu.vector_store %arg6[%c0_6, %c0_7], %12 {strides = array<i32>} : memref<4x8xf32, #tpu.memory_space<vmem>>, vector<4x8xf32>,
    %cst_8 = arith.constant 1.000000e+00 : f32
    %14 = vector.broadcast %cst_8 : f32 to vector<32x1xf32>
    %c0_9 = arith.constant 0 : index
    %c0_10 = arith.constant 0 : index
    %15 = vector.load %arg7[%c0_9, %c0_10] : memref<4x1xf32, #tpu.memory_space<vmem>>, vector<4x1xf32>
    %cst_11 = arith.constant dense<0.000000e+00> : vector<4x1xf32>
    %16 = tpu.matmul %9, %14, %cst_11 {dimension_numbers = #tpu.dot_dimension_numbers<[1], [0], [0], [1], [0, 0, 1, 1], [], []>} : vector<4x32xf32>, vector<32x1xf32>, vector<4x1xf32> -> vector<4x1xf32>
    %17 = arith.addf %15, %16 : vector<4x1xf32>
    %c0_12 = arith.constant 0 : index
    %c0_13 = arith.constant 0 : index
    %18 = vector.load %arg7[%c0_12, %c0_13] : memref<4x1xf32, #tpu.memory_space<vmem>>, vector<4x1xf32>
    tpu.vector_store %arg7[%c0_12, %c0_13], %17 {strides = array<i32>} : memref<4x1xf32, #tpu.memory_space<vmem>>, vector<4x1xf32>,
    %c0_i32_14 = arith.constant 0 : i32
    %19 = arith.cmpi eq, %arg1, %c0_i32_14 : i32
    %20 = arith.extui %19 : i1 to i32
    %c0_i32_15 = arith.constant 0 : i32
    %21 = arith.cmpi ne, %20, %c0_i32_15 : i32
    scf.if %21 {
      %c0_16 = arith.constant 0 : index
      %c0_17 = arith.constant 0 : index
      %22 = vector.load %arg6[%c0_16, %c0_17] : memref<4x8xf32, #tpu.memory_space<vmem>>, vector<4x8xf32>
      %c0_18 = arith.constant 0 : index
      %c0_19 = arith.constant 0 : index
      %c0_20 = arith.constant 0 : index
      %23 = vector.load %arg4[%c0_18, %c0_19, %c0_20] : memref<1x4x8xf32, #tpu.memory_space<vmem>>, vector<1x4x8xf32>
      %24 = vector.shape_cast %23 : vector<1x4x8xf32> to vector<4x8xf32>
      %25 = vector.shape_cast %22 : vector<4x8xf32> to vector<1x4x8xf32>
      tpu.vector_store %arg4[%c0_18, %c0_19, %c0_20], %25 {strides = array<i32>} : memref<1x4x8xf32, #tpu.memory_space<vmem>>, vector<1x4x8xf32>,
      %c0_21 = arith.constant 0 : index
      %c0_22 = arith.constant 0 : index
      %26 = vector.load %arg7[%c0_21, %c0_22] : memref<4x1xf32, #tpu.memory_space<vmem>>, vector<4x1xf32>
      %c0_23 = arith.constant 0 : index
      %c0_24 = arith.constant 0 : index
      %c0_25 = arith.constant 0 : index
      %27 = vector.load %arg5[%c0_23, %c0_24, %c0_25] : memref<1x4x1xf32, #tpu.memory_space<vmem>>, vector<1x4x1xf32>
      %28 = vector.shape_cast %27 : vector<1x4x1xf32> to vector<4x1xf32>
      %29 = vector.shape_cast %26 : vector<4x1xf32> to vector<1x4x1xf32>
      tpu.vector_store %arg5[%c0_23, %c0_24, %c0_25], %29 {strides = array<i32>} : memref<1x4x1xf32, #tpu.memory_space<vmem>>, vector<1x4x1xf32>,
    } else {
    }
    return
  }
  func.func @transform_0(%arg0: i32, %arg1: i32) -> (i32, i32) {
    %c1_i32 = arith.constant 1 : i32
    %0 = arith.muli %arg0, %c1_i32 : i32
    %1 = arith.addi %0, %arg1 : i32
    %c0_i32 = arith.constant 0 : i32
    %c0_i32_0 = arith.constant 0 : i32
    return %c0_i32, %1 : i32, i32
  }
  func.func @transform_1(%arg0: i32, %arg1: i32) -> (i32, i32) {
    %c1_i32 = arith.constant 1 : i32
    %0 = arith.muli %arg0, %c1_i32 : i32
    %1 = arith.addi %0, %arg1 : i32
    %c0_i32 = arith.constant 0 : i32
    %c0_i32_0 = arith.constant 0 : i32
    return %1, %c0_i32 : i32, i32
  }
  func.func @transform_2(%arg0: i32, %arg1: i32) -> (i32, i32, i32) {
    %c0_i32 = arith.constant 0 : i32
    %c0_i32_0 = arith.constant 0 : i32
    %c0_i32_1 = arith.constant 0 : i32
    return %arg0, %c0_i32, %c0_i32_0 : i32, i32, i32
  }
  func.func @transform_3(%arg0: i32, %arg1: i32) -> (i32, i32, i32) {
    %c0_i32 = arith.constant 0 : i32
    %c0_i32_0 = arith.constant 0 : i32
    %c0_i32_1 = arith.constant 0 : i32
    return %arg0, %c0_i32, %c0_i32_0 : i32, i32, i32
  }
}

</mosaic_0001>

<bundles_post_ra>
// kernel: tpu_custom_call.1
= control target key start
LH: loop header
LB: loop body
LE: loop exit
PB: predicated region body
PF: predicated region fallthrough
CT: control target
= control target key end

     0   :  { %v63_v1 = vlaneseq  ;;  %v320_v2 = vmov 0.0   ;;  %vm54_vm0 = vcmask 60416   ;;  %v321_v5 = vmov 1.0   ;;  %s371_s0 = inlined_call_operand.vmem [shape: s32[1,32], index: 0, kind: input, shape index: {}]   ;;  %s372_s1 = inlined_call_operand.vmem [shape: f32[32,8], index: 1, kind: input, shape index: {}]   ;;  %s373_s2 = inlined_call_operand.hbm [shape: f32[1,4,8], index: 2, kind: output, shape index: {0}]   ;;  %s374_s3 = inlined_call_operand.vmem [shape: f32[1,4,1], index: 3, kind: output, shape index: {1}]  }
   0x1   :  { %v61_v0 = vld [vmem:[%s372_s1 + $0x18] sm:$0xff]  ;;  %272 = vmatprep.subr.mxu0 %v320_v2  ;;  %283 = vmatprep.subr.mxu1 %v320_v2  ;;  %v60_v3 = vld [vmem:[%s372_s1 + $0x10] sm:$0xff]  ;;  %v258_v4 = vld [vmem:[%s371_s0] ss:$0 sm:$0xff]  ;;  %55 = vst.msk [vmem:[#allocation2] sm:$0xf] %vm54_vm0, %v320_v2 }
   0x2   :  { %273 = vmatpush3.msra.mxu0 %v61_v0  ;;  %284 = vmatpush3.msra.mxu1 %v321_v5  ;;  %v64_v6 = vshrl.u32 %v63_v1, 7 }
   0x3   :  { %9 = vsyncpa [#allocation5], 0  ;;  %274 = vmatprep.subr.mxu0 %v320_v2  ;;  %285 = vmatprep.subr.mxu1 %v320_v2  ;;  %v59_v7 = vld [vmem:[%s372_s1 + $0x8] sm:$0xff]  ;;  %v58_v8 = vld [vmem:[%s372_s1] sm:$0xff]  ;;  %vm73_vm2 = vcmask 261120   ;;  %vm322_vm3 = vmmov 0  }
   0x4   :  { %275 = vmatpush3.msra.mxu0 %v60_v3  ;;  %286 = vmatpush3.msra.mxu1 %v321_v5  ;;  %vm69_vm1 = vcmp.eq.s32.totalorder %v258_v4, %v64_v6  ;;  %vm56_vm4 = vcmask 3072   ;;  %s323_s1 = smov [#allocation4]  }
   0x5   :  { %276 = vmatprep.subr.mxu0 %v320_v2  ;;  %287 = vmatprep.subr.mxu1 %v320_v2  ;;  %v259_v9 = vsel %vm69_vm1, 1.0, %v320_v2  ;;  %57 = vst.msk [vmem:[#allocation3] sm:$0xf] %vm56_vm4, %v320_v2  ;;  %s237_s21 = sshll.u32 %s323_s1, 4  ;;  %s238_s21 = int_to_ptr.vmem [resolvable:$true] %s237_s21 }
   0x6   :  { %277 = vmatpush3.msra.mxu0 %v59_v7  ;;  %288 = vmatpush3.msra.mxu1 %v321_v5  ;;  %s298_s24 = scalar_lea.vmem %s238_s21, 64  ;;  %p303_p1 = scmp.lt.s32.totalorder %s238_s21, %s238_s21 }
   0x7   :  { %278 = vmatprep.subr.mxu0 %v320_v2  ;;  %289 = vmatprep.subr.mxu1 %v320_v2  ;;  %p299_p0 = scmp.ne.s32.totalorder %s238_s21, %s298_s24  ;;  %p304_p2 = scmp.lt.s32.totalorder %s298_s24, %s298_s24 }
   0x8   :  { %279 = vmatpush3.msra.mxu0 %v58_v8  ;;  %280 = vmatprep.mubr.msk.f32.mxu0 %vm322_vm3, %v320_v2  ;;  %v72_v10 = vld [vmem:[#allocation2] sm:$0xf] }
   0x9   :  { %290 = vmatpush3.msra.mxu1 %v321_v5  ;;  %291 = vmatprep.mubr.msk.f32.mxu1 %vm322_vm3, %v320_v2  ;;  %p305_p3 = por %p304_p2, %p303_p1 }
   0xa   :  { %281 = vmatmul.mubr.msk.f32.vlgmr.msra.gmra.mxu0 %vm73_vm2, %v259_v9  ;;  %292 = vmatmul.mubr.msk.f32.vlgmr.msra.gmra.mxu1 %vm73_vm2, %v259_v9 }
   0xb   :  { %p306_p4 = pnand %p305_p3, %p299_p0 }
   0xc   :  { %v150_v11 = vld [vmem:[#allocation3] sm:$0xf] }
  0xca   :  { %v143_v12 = vpop.f32.mrf.mxu0  ;;  %v217_v13 = vpop.f32.mrf.mxu1 }
  0xcb   :  { %v147_v14 = vadd.f32 %v143_v12, %v72_v10  ;;  %v221_v15 = vadd.f32 %v217_v13, %v150_v11 }
  0xcc   :  { %v282_v16 = vpop.f32.mrf.mxu0  ;;  %v293_v17 = vpop.f32.mrf.mxu1 }
  0xcd   :  { %149 = vst.msk [vmem:[#allocation2] sm:$0xf] %vm54_vm0, %v147_v14 }
  0xce   :  { %223 = vst.msk [vmem:[#allocation3] sm:$0xf] %vm56_vm4, %v221_v15 }
  0xd4   :  { %v227_v19 = vld [vmem:[#allocation2] sm:$0xf] }
  0xd5   :  { %v229_v18 = vld [vmem:[#allocation3] sm:$0xf]  ;;  %228 = vst.msk [vmem:[#allocation4] sm:$0xf] %vm54_vm0, %v227_v19 }
  0xd6   :  { %230 = vst.msk [vmem:[%s374_s3] sm:$0xf] %vm56_vm4, %v229_v18 }
  0xd7   :  { %309 = shalt.err (!%p306_p4)
}
  0xd8   :  { %240 = dma.vmem_to_hbm [thread:$0]  %s238_s21, 64, %s373_s2, [#allocation5]  }
  0xd9   :  { %318 = dma.done.wait [#allocation5], 64  }
  0xda   :  { %319 = vsyncadd [#allocation5], 4294967232 }
  0xdb   :  { %248 = vsyncpa [#allocation5], 1 }

</bundles_post_ra>
